<compile_context>
chip_gen: v7x
topology: tpu7x:2x2x1
jax: 0.10.0
libtpu: 0.0.40
codegen_flags: <defaults>
</compile_context>

<pallas_src>
import functools
import math

import jax
import jax.numpy as jnp
from jax.experimental import pallas as pl
from jax.experimental.pallas import tpu as pltpu


def _round_up(x, n):
    return (x + n - 1) // n * n


def _lora_kernel_single(x_ref, a_ref, b_ref, o_ref):
    """Whole contraction resident: o = (x @ A) @ B_scaled in one step."""
    xa = jnp.dot(x_ref[...], a_ref[...], preferred_element_type=jnp.float32)
    o_ref[...] = jnp.dot(xa.astype(b_ref.dtype), b_ref[...],
                         preferred_element_type=jnp.float32).astype(o_ref.dtype)


def _lora_kernel_multi(x_ref, a_ref, b_ref, o_ref, acc_ref, *, tk, a_resident):
    """Tiled contraction: accumulate x@A in f32, finalize with @B_scaled on the
    last K step.  Grid = (M tiles, K tiles)."""
    k = pl.program_id(1)

    @pl.when(k == 0)
    def _():
        acc_ref[...] = jnp.zeros_like(acc_ref)

    if a_resident:
        start = pl.multiple_of(k * tk, 128)          # A fully VMEM-resident; slice it
        a_blk = a_ref[pl.ds(start, tk), :]
    else:
        a_blk = a_ref[...]                           # per-K pipelined A block

    acc_ref[...] += jnp.dot(x_ref[...], a_blk, preferred_element_type=jnp.float32)

    @pl.when(k == pl.num_programs(1) - 1)
    def _():
        xa = acc_ref[...].astype(b_ref.dtype)
        o_ref[...] = jnp.dot(xa, b_ref[...],
                             preferred_element_type=jnp.float32).astype(o_ref.dtype)


def lora_forward(x, A, B, alpha, *, tm=None, tk=None):
    """alpha * (x @ A @ B), matching the PyTorch LoRALayer.forward semantics."""
    in_dim, rank = A.shape
    rank_b, out_dim = B.shape
    assert rank == rank_b and x.shape[-1] == in_dim

    lead_shape = x.shape[:-1]
    m = int(math.prod(lead_shape)) if lead_shape else 1
    x2d = x.reshape(m, in_dim)

    dtype_bytes = jnp.dtype(x.dtype).itemsize
    min_sub = {4: 8, 2: 16, 1: 32}.get(dtype_bytes, 8)   # min sublane tile per dtype
    lane = 128

    # Fold alpha into the tiny B once (free) instead of a per-tile VPU scale.
    b_scaled = (jnp.float32(alpha) * B.astype(jnp.float32)).astype(B.dtype)

    # Lane-dense output: pad out_dim < 128 up to one full vreg lane width.
    out_dim_p = out_dim if out_dim >= lane else lane
    if out_dim_p != out_dim:
        b_scaled = jnp.pad(b_scaled, ((0, 0), (0, out_dim_p - out_dim)))

    # ---- Generation-aware VMEM budget --------------------------------------
    try:
        vmem_cap = int(pltpu.get_tpu_info().vmem_capacity_bytes)
    except Exception:
        vmem_cap = 64 * 1024 * 1024                      # conservative (v7x per-core)
    vmem_limit = max(16 * 1024 * 1024, int(vmem_cap * 0.8))
    budget = int(vmem_limit * 0.85)                      # tile budget under the limit

    # ---- K (contraction) tile ----------------------------------------------
    if tk is None:
        resident_cost = (2 * 512 * in_dim * dtype_bytes          # x (512-row, dbl-buf)
                         + 2 * in_dim * lane * dtype_bytes)      # A (rank lane-pads to 128)
        if resident_cost <= budget // 2:
            tk = in_dim                                          # whole K resident
        else:
            tk_max = 1024 if budget >= 64 * 1024 * 1024 else 512
            tk = 0
            for cand in range(tk_max, lane - 1, -lane):          # lane-aligned divisor
                if in_dim % cand == 0:
                    tk = cand
                    break
            if tk == 0:
                tk = tk_max                                      # zero-pad fallback
    tk = min(tk, in_dim)
    if tk < in_dim:
        tk = max(lane, (tk // lane) * lane)

    n_k = pl.cdiv(in_dim, tk)
    k_padded = n_k * tk
    pad_k = k_padded - in_dim
    a_p = A
    if pad_k:
        # Rare fallback (in_dim has no lane-aligned divisor <= tk_max): zero-pad
        # BOTH x and A along K so the ragged K tail contributes exactly 0.
        x2d = jnp.pad(x2d, ((0, 0), (0, pad_k)))
        a_p = jnp.pad(A, ((0, pad_k), (0, 0)))

    # Keep A fully VMEM-resident unless it would eat too much of the budget.
    a_resident = (n_k == 1) or (2 * k_padded * lane * dtype_bytes <= budget // 2)

    # ---- M tile: largest that fits the budget (lane/sublane-padding aware) --
    a_vmem = 2 * (k_padded if a_resident else tk) * lane * dtype_bytes
    b_vmem = 2 * _round_up(rank, min_sub) * out_dim_p * dtype_bytes
    fixed = a_vmem + b_vmem
    per_row = (2 * tk * dtype_bytes                         # x (double-buffered)
               + 2 * out_dim_p * dtype_bytes                # out (double-buffered)
               + (lane * 4 if n_k > 1 else 0))              # f32 acc scratch (lane-padded)
    if tm is None:
        tm = max(min_sub, (budget - fixed) // per_row)
        tm = min(tm, 1024)
    if tm >= m:
        tm = m                                              # single full block (any m)
    elif tm >= 128:
        tm = (tm // 128) * 128
    else:
        tm = max(min_sub, (tm // min_sub) * min_sub)

    # Megacore (v7x): keep >= 2 tiles on the "parallel" M axis when m is big.
    if tm == m and m >= 256:
        tm = _round_up(pl.cdiv(m, 2), 128)

    n_m = pl.cdiv(m, tm)

    cost = pl.CostEstimate(
        flops=2 * m * rank * (in_dim + out_dim),
        transcendentals=0,
        bytes_accessed=(m * (in_dim + out_dim)
                        + in_dim * rank + rank * out_dim) * dtype_bytes,
    )
    compiler_params = pltpu.CompilerParams(
        dimension_semantics=("parallel",) if n_k == 1 else ("parallel", "arbitrary"),
        vmem_limit_bytes=vmem_limit,
    )

    if n_k == 1:
        grid_spec = pltpu.PrefetchScalarGridSpec(
            num_scalar_prefetch=0,
            grid=(n_m,),
            in_specs=[
                pl.BlockSpec((tm, k_padded), lambda i: (i, 0)),        # x tile
                pl.BlockSpec((k_padded, rank), lambda i: (0, 0)),      # A (resident)
                pl.BlockSpec((rank, out_dim_p), lambda i: (0, 0)),     # B (resident)
            ],
            out_specs=pl.BlockSpec((tm, out_dim_p), lambda i: (i, 0)),
        )
        kernel = _lora_kernel_single
    else:
        if a_resident:
            a_spec = pl.BlockSpec((k_padded, rank), lambda i, k: (0, 0))
        else:
            a_spec = pl.BlockSpec((tk, rank), lambda i, k: (k, 0))
        grid_spec = pltpu.PrefetchScalarGridSpec(
            num_scalar_prefetch=0,
            grid=(n_m, n_k),
            in_specs=[
                pl.BlockSpec((tm, tk), lambda i, k: (i, k)),           # x tile
                a_spec,                                                # A
                pl.BlockSpec((rank, out_dim_p), lambda i, k: (0, 0)),  # B (resident)
            ],
            out_specs=pl.BlockSpec((tm, out_dim_p), lambda i, k: (i, 0)),
            scratch_shapes=[pltpu.VMEM((tm, rank), jnp.float32)],
        )
        kernel = functools.partial(_lora_kernel_multi, tk=tk, a_resident=a_resident)

    out2d = pl.pallas_call(
        kernel,
        out_shape=jax.ShapeDtypeStruct((m, out_dim_p), x.dtype),
        grid_spec=grid_spec,
        compiler_params=compiler_params,
        cost_estimate=cost,
    )(x2d, a_p, b_scaled)

    if out_dim_p != out_dim:
        out2d = out2d[:, :out_dim]
    return out2d.reshape(*lead_shape, out_dim)


def init_lora_params(key, in_dim, rank, out_dim, dtype=jnp.float32):
    """Deterministic re-implementation of the PyTorch __init__.

    A: kaiming_uniform_(a=sqrt(5)) -> U(-bound, bound), bound = sqrt(3)*gain/sqrt(fan_in),
       gain = sqrt(2/(1+a^2)), fan_in = A.shape[1] (= rank, torch's 2-D convention).
    B: zeros.
    """
    a = math.sqrt(5.0)
    fan_in = rank
    gain = math.sqrt(2.0 / (1.0 + a * a))
    std = gain / math.sqrt(fan_in)
    bound = math.sqrt(3.0) * std
    A = jax.random.uniform(key, (in_dim, rank), dtype=dtype,
                           minval=-bound, maxval=bound)
    B = jnp.zeros((rank, out_dim), dtype=dtype)
    return A, B


if __name__ == "__main__":
    key = jax.random.PRNGKey(0)
    k_x, k_a, k_b = jax.random.split(key, 3)

    batch, seq, in_dim, rank, out_dim = 2, 8, 32, 4, 32
    alpha = 16.0

    x = jax.random.normal(k_x, (batch, seq, in_dim), dtype=jnp.float32)
    A, B = init_lora_params(k_a, in_dim, rank, out_dim)
    # B is zeros by spec; also use a random B so the check is non-trivial.
    B_chk = jax.random.normal(k_b, (rank, out_dim), dtype=jnp.float32)

    # Zero-B path (exact LoRALayer init): output must be all zeros.
    out0 = jax.block_until_ready(lora_forward(x, A, B, alpha))
    assert out0.shape == (batch, seq, out_dim)
    assert jnp.allclose(out0, jnp.zeros_like(out0), atol=1e-6)

    # Non-trivial check of the forward semantics against pure JAX.
    out = jax.block_until_ready(lora_forward(x, A, B_chk, alpha))
    ref = alpha * (x @ A @ B_chk)
    assert out.shape == (batch, seq, out_dim)
    assert jnp.allclose(out, ref, atol=1e-4, rtol=1e-4)

    print("KERNEL_OK")
</pallas_src>

<mosaic_0001>
module attributes {stable_mosaic.version = 11 : i64} {
  func.func @_lora_kernel_single(%arg0: i32, %arg1: memref<16x32xf32, #tpu.memory_space<vmem>>, %arg2: memref<32x4xf32, #tpu.memory_space<vmem>>, %arg3: memref<4x128xf32, #tpu.memory_space<vmem>>, %arg4: memref<16x128xf32, #tpu.memory_space<vmem>>) attributes {dimension_semantics = [#tpu.dimension_semantics<parallel>], iteration_bounds = array<i64: 1>, scalar_prefetch = 0 : i64, scratch_operands = 0 : i64, tpu.core_type = #tpu.core_type<tc>, window_params = [{transform_indices = @transform_0, window_bounds = array<i64: 16, 32>}, {pipeline_mode = #tpu.pipeline_mode<synchronous>, transform_indices = @transform_1, window_bounds = array<i64: 32, 4>}, {pipeline_mode = #tpu.pipeline_mode<synchronous>, transform_indices = @transform_2, window_bounds = array<i64: 4, 128>}, {transform_indices = @transform_3, window_bounds = array<i64: 16, 128>}]} {
    %c0 = arith.constant 0 : index
    %c0_0 = arith.constant 0 : index
    %0 = vector.load %arg1[%c0, %c0_0] : memref<16x32xf32, #tpu.memory_space<vmem>>, vector<16x32xf32>
    %c0_1 = arith.constant 0 : index
    %c0_2 = arith.constant 0 : index
    %1 = vector.load %arg2[%c0_1, %c0_2] : memref<32x4xf32, #tpu.memory_space<vmem>>, vector<32x4xf32>
    %cst = arith.constant dense<0.000000e+00> : vector<16x4xf32>
    %2 = tpu.matmul %0, %1, %cst {dimension_numbers = #tpu.dot_dimension_numbers<[1], [0], [0], [1], [0, 0, 1, 1], [], []>} : vector<16x32xf32>, vector<32x4xf32>, vector<16x4xf32> -> vector<16x4xf32>
    %c0_3 = arith.constant 0 : index
    %c0_4 = arith.constant 0 : index
    %3 = vector.load %arg3[%c0_3, %c0_4] : memref<4x128xf32, #tpu.memory_space<vmem>>, vector<4x128xf32>
    %cst_5 = arith.constant dense<0.000000e+00> : vector<16x128xf32>
    %4 = tpu.matmul %2, %3, %cst_5 {dimension_numbers = #tpu.dot_dimension_numbers<[1], [0], [0], [1], [0, 0, 1, 1], [], []>} : vector<16x4xf32>, vector<4x128xf32>, vector<16x128xf32> -> vector<16x128xf32>
    %c0_6 = arith.constant 0 : index
    %c0_7 = arith.constant 0 : index
    %5 = vector.load %arg4[%c0_6, %c0_7] : memref<16x128xf32, #tpu.memory_space<vmem>>, vector<16x128xf32>
    tpu.vector_store %arg4[%c0_6, %c0_7], %4 {strides = array<i32>} : memref<16x128xf32, #tpu.memory_space<vmem>>, vector<16x128xf32>,
    return
  }
  func.func @transform_0(%arg0: i32) -> (i32, i32) {
    %c0_i32 = arith.constant 0 : i32
    %c0_i32_0 = arith.constant 0 : i32
    return %arg0, %c0_i32 : i32, i32
  }
  func.func @transform_1(%arg0: i32) -> (i32, i32) {
    %c0_i32 = arith.constant 0 : i32
    %c0_i32_0 = arith.constant 0 : i32
    %c0_i32_1 = arith.constant 0 : i32
    return %c0_i32, %c0_i32_0 : i32, i32
  }
  func.func @transform_2(%arg0: i32) -> (i32, i32) {
    %c0_i32 = arith.constant 0 : i32
    %c0_i32_0 = arith.constant 0 : i32
    %c0_i32_1 = arith.constant 0 : i32
    return %c0_i32, %c0_i32_0 : i32, i32
  }
  func.func @transform_3(%arg0: i32) -> (i32, i32) {
    %c0_i32 = arith.constant 0 : i32
    %c0_i32_0 = arith.constant 0 : i32
    return %arg0, %c0_i32 : i32, i32
  }
}

</mosaic_0001>

<bundles_post_ra>
// kernel: tpu_custom_call.1
= control target key start
LH: loop header
LB: loop body
LE: loop exit
PB: predicated region body
PF: predicated region fallthrough
CT: control target
= control target key end

     0   :  { %vm21_vm0 = vcmask 261120   ;;  %s329_s0 = inlined_call_operand.vmem [shape: f32[16,32], index: 0, kind: input, shape index: {}]   ;;  %s330_s1 = inlined_call_operand.vmem [shape: f32[32,4], index: 1, kind: input, shape index: {}]   ;;  %s331_s2 = inlined_call_operand.vmem [shape: f32[4,128], index: 2, kind: input, shape index: {}]   ;;  %s332_s3 = inlined_call_operand.hbm [shape: f32[16,128], index: 3, kind: output, shape index: {}]  }
   0x1   :  { %v17_v0 = vld [vmem:[%s330_s1] sm:$0xff]  ;;  %v18_v1 = vld [vmem:[%s330_s1 + $0x8] sm:$0xff]  ;;  %v19_v2 = vld [vmem:[%s330_s1 + $0x10] sm:$0xff] }
   0x2   :  { %v238_v3 = vpack.c.bf16 %v18_v1, %v17_v0  ;;  %v20_v4 = vld [vmem:[%s330_s1 + $0x18] sm:$0xff]  ;;  %v15_v5 = vld [vmem:[%s329_s0] sm:$0xff] }
   0x3   :  { %v242_v6 = vpack.c.bf16 %v20_v4, %v19_v2  ;;  %230 = vmatprep.mubr.msk.f32.mxu0 %vm21_vm0, %v15_v5 }
   0x4   :  { %8 = vsyncpa [#allocation3], 0  ;;  %239 = vmatprep.subr.bf16.mxu0 %v238_v3  ;;  %v16_v7 = vld [vmem:[%s329_s0 + $0x8] sm:$0xff]  ;;  %v103_v8 = vld [vmem:[%s331_s2] sm:$0xf]  ;;  %vm111_vm1 = vcmask 1043456  }
   0x5   :  { %241 = vmatpush3.bf16.msra.mxu0 %v238_v3  ;;  %233 = vmatprep.subr.msk.mxu1 %vm111_vm1, %v103_v8  ;;  %vm104_vm2 = vcmask 31744   ;;  %s273_s1 = smov [#allocation2]  }
   0x6   :  { %243 = vmatprep.subr.bf16.mxu0 %v242_v6  ;;  %234 = vmatpush3.msk.msra.mxu1 %vm111_vm1, %v103_v8  ;;  %s197_s26 = sshll.u32 %s273_s1, 4  ;;  %s198_s26 = int_to_ptr.vmem [resolvable:$true] %s197_s26 }
   0x7   :  { %s249_s0 = scalar_lea.vmem %s198_s26, 256  ;;  %p254_p1 = scmp.lt.s32.totalorder %s198_s26, %s198_s26 }
   0x8   :  { %p250_p0 = scmp.ne.s32.totalorder %s198_s26, %s249_s0  ;;  %p255_p2 = scmp.lt.s32.totalorder %s249_s0, %s249_s0 }
   0x9   :  { %245 = vmatpush3.bf16.msra.mxu0 %v242_v6 }
   0xa   :  { %p256_p3 = por %p255_p2, %p254_p1 }
   0xc   :  { %231 = vmatmul.mubr.msk.f32.vlgmr.msra.gmra.mrb[0].mxu0 %vm21_vm0, %v16_v7  ;;  %p257_p4 = pnand %p256_p3, %p250_p0 }
  0xdf   :  { %v232_v9 = vpop.f32.mrb[0].mxu0 }
  0xe0   :  { %v94_v10 = vpop.f32.mrb[1].mxu0 }
  0xe1   :  { %235 = vmatprep.mubr.msk.f32.mxu1 %vm104_vm2, %v94_v10 }
  0xe2   :  { %236 = vmatmul.mubr.msk.f32.vlgmr.msra.gmra.mrb[0].mxu1 %vm104_vm2, %v232_v9 }
 0x1b5   :  { %v237_v11 = vpop.f32.mrb[0].mxu1 }
 0x1b6   :  { %191 = vst [vmem:[#allocation2 + $0x8] sm:$0xff] %v237_v11  ;;  %v181_v12 = vpop.f32.mrb[1].mxu1 }
 0x1b7   :  { %190 = vst [vmem:[#allocation2] sm:$0xff] %v181_v12 }
 0x1b8   :  { %260 = shalt.err (!%p257_p4)
}
 0x1b9   :  { %s261_s28 = scalar_lea.hbm %s332_s3, 256 }
 0x1ba   :  { %p262_p5 = scmp.ne.s32.totalorder %s332_s3, %s261_s28  ;;  %p265_p6 = scmp.lt.u32.totalorder %s261_s28, %s332_s3 }
 0x1bc   :  { %p267_p7 = pnand %p265_p6, %p262_p5 }
 0x1be   :  { %270 = shalt.err (!%p267_p7)
}
 0x1bf   :  { %s274_s6 = smov 128   ;;  %s275_s7 = smov 8  }
 0x1c0   :  { %203 = dma.vmem_to_hbm [thread:$0]  %s198_s26, 256, %s332_s3, [#allocation3], %s274_s6, %s274_s6, %s275_s7  }
 0x1c1   :  { %271 = dma.done.wait [#allocation3], 256  }
 0x1c2   :  { %272 = vsyncadd [#allocation3], 4294967040 }
 0x1c3   :  { %207 = vsyncpa [#allocation3], 1 }

</bundles_post_ra>
